<compile_context>
chip_gen: v7x
topology: tpu7x:2x2x1
jax: 0.10.0
libtpu: 0.0.40
codegen_flags: <defaults>
</compile_context>

<pallas_src>
import functools

import jax
import jax.numpy as jnp
from jax.experimental import pallas as pl
from jax.experimental.pallas import tpu as pltpu

_LANES = 128


def _as_i32(u):
    """Python helper: reinterpret a uint32 constant as a signed int32 value."""
    u &= 0xFFFFFFFF
    return u - (1 << 32) if u >= (1 << 31) else u


# murmur3 fmix32 constants (wrapped to signed 32-bit) and mixing constants.
_C1 = _as_i32(0x85EBCA6B)
_C2 = _as_i32(0xC2B2AE35)
_GOLD = _as_i32(0x9E3779B9)      # golden-ratio multiplier for the counter
_SEED_MUL = _as_i32(0x7FEB352D)  # odd multiplier for the seed
_SALT_R = 0x01234567
_SALT_I = 0x0ABCDEF1


def _srl(h, n):
    """Logical right shift of int32 (arithmetic shift + mask of sign bits)."""
    return (h >> n) & ((1 << (32 - n)) - 1)


def _fmix32(h):
    """murmur3 finalizer — bit-identical to the uint32 version."""
    h = h ^ _srl(h, 16)
    h = h * _C1
    h = h ^ _srl(h, 13)
    h = h * _C2
    h = h ^ _srl(h, 16)
    return h


def _round_up(a, b):
    return (a + b - 1) // b * b


def _complex_dropout_kernel(seed_ref, xr_ref, xi_ref, or_ref, oi_ref,
                            *, p, tile_r, lanes):
    # Static (trace-time) constants.
    threshold = int(round(p * (1 << 24)))
    threshold = max(0, min(threshold, 1 << 24))
    scale = 1.0 / (1.0 - p)

    seed = seed_ref[0]
    # Global element index of each entry in this tile (counter for the hash).
    base = pl.program_id(0) * (tile_r * lanes)
    row = jax.lax.broadcasted_iota(jnp.int32, (tile_r, lanes), 0)
    lane = jax.lax.broadcasted_iota(jnp.int32, (tile_r, lanes), 1)
    idx = base + row * lanes + lane

    def keep_mask(salt):
        h = idx * _GOLD + seed * _SEED_MUL + salt
        h = _fmix32(h)
        u24 = h & 0x00FFFFFF          # uniform in [0, 2^24)
        return u24 >= threshold       # P(keep) = 1 - p

    # Real part.
    xr = xr_ref[...]
    kr = keep_mask(_SALT_R)
    or_ref[...] = jnp.where(kr, xr * scale, jnp.zeros_like(xr)).astype(or_ref.dtype)

    # Imaginary part (independent mask via a different salt).
    xi = xi_ref[...]
    ki = keep_mask(_SALT_I)
    oi_ref[...] = jnp.where(ki, xi * scale, jnp.zeros_like(xi)).astype(oi_ref.dtype)


def complex_dropout(input_r, input_i, p=0.5, inplace=False, *, seed=0, training=True):
    """Pallas ComplexDropout forward.  Returns (out_r, out_i)."""
    del inplace  # no-op in a functional setting
    if input_r.shape != input_i.shape:
        raise ValueError("real/imag shapes must match")
    if p < 0.0 or p > 1.0:
        raise ValueError(f"dropout probability must be in [0, 1], got {p}")
    if (not training) or p == 0.0:
        return input_r, input_i
    if p >= 1.0:
        return jnp.zeros_like(input_r), jnp.zeros_like(input_i)

    orig_shape = input_r.shape
    total = input_r.size
    lanes = _LANES
    rows = -(-total // lanes)
    tile_r = min(1024, _round_up(max(rows, 1), 8))   # <=512 KiB per f32 tile
    rows_p = _round_up(rows, tile_r)
    padded = rows_p * lanes

    def prep(x):
        xf = x.reshape(-1)
        if padded != total:
            xf = jnp.pad(xf, (0, padded - total))
        return xf.reshape(rows_p, lanes)

    xr2, xi2 = prep(input_r), prep(input_i)
    seed_arr = jnp.asarray([seed], dtype=jnp.int32)

    kernel = functools.partial(_complex_dropout_kernel,
                               p=float(p), tile_r=tile_r, lanes=lanes)

    out_r, out_i = pl.pallas_call(
        kernel,
        out_shape=(
            jax.ShapeDtypeStruct((rows_p, lanes), input_r.dtype),
            jax.ShapeDtypeStruct((rows_p, lanes), input_i.dtype),
        ),
        grid_spec=pltpu.PrefetchScalarGridSpec(
            num_scalar_prefetch=1,
            grid=(rows_p // tile_r,),
            in_specs=[
                pl.BlockSpec((tile_r, lanes), lambda i, s: (i, 0)),
                pl.BlockSpec((tile_r, lanes), lambda i, s: (i, 0)),
            ],
            out_specs=[
                pl.BlockSpec((tile_r, lanes), lambda i, s: (i, 0)),
                pl.BlockSpec((tile_r, lanes), lambda i, s: (i, 0)),
            ],
        ),
        compiler_params=pltpu.CompilerParams(
            dimension_semantics=("parallel",)),
    )(seed_arr, xr2, xi2)

    def post(o):
        of = o.reshape(-1)
        if padded != total:
            of = of[:total]
        return of.reshape(orig_shape)

    return post(out_r), post(out_i)


if __name__ == "__main__":
    key = jax.random.PRNGKey(0)
    kr, ki = jax.random.split(key)

    # Small NCHW complex-valued input: batch=2, channels=4, spatial=16x16.
    shape = (2, 4, 16, 16)
    x_r = jax.random.normal(kr, shape, dtype=jnp.float32)
    x_i = jax.random.normal(ki, shape, dtype=jnp.float32)

    p = 0.5
    out_r, out_i = complex_dropout(x_r, x_i, p=p, seed=0)
    out_r, out_i = jax.block_until_ready(out_r), jax.block_until_ready(out_i)

    # Sanity checks: shapes preserved; surviving elements are scaled by 1/(1-p);
    # dropped elements are exactly zero; keep fraction close to 1-p.
    assert out_r.shape == shape and out_i.shape == shape
    scale = 1.0 / (1.0 - p)
    for x, o in ((x_r, out_r), (x_i, out_i)):
        kept = o != 0.0
        assert jnp.allclose(o[kept], x[kept] * scale, rtol=1e-6, atol=1e-6)
        frac_kept = float(jnp.mean(kept.astype(jnp.float32)))
        assert 0.3 < frac_kept < 0.7, f"keep fraction {frac_kept} not near 1-p"
    # Masks for real and imaginary parts should be independent (not identical).
    assert bool(jnp.any((out_r != 0.0) != (out_i != 0.0)))

    # Eval mode / p=0 are identity.
    er, ei = complex_dropout(x_r, x_i, p=p, training=False)
    assert jnp.array_equal(er, x_r) and jnp.array_equal(ei, x_i)

    print("KERNEL_OK")
</pallas_src>

<mosaic_0001>
module attributes {stable_mosaic.version = 11 : i64} {
  func.func @_complex_dropout_kernel(%arg0: i32, %arg1: memref<1xi32, #tpu.memory_space<smem>>, %arg2: memref<16x128xf32, #tpu.memory_space<vmem>>, %arg3: memref<16x128xf32, #tpu.memory_space<vmem>>, %arg4: memref<16x128xf32, #tpu.memory_space<vmem>>, %arg5: memref<16x128xf32, #tpu.memory_space<vmem>>) attributes {dimension_semantics = [#tpu.dimension_semantics<parallel>], iteration_bounds = array<i64: 1>, scalar_prefetch = 1 : i64, scratch_operands = 0 : i64, tpu.core_type = #tpu.core_type<tc>, window_params = [{transform_indices = @transform_0, window_bounds = array<i64: 16, 128>}, {transform_indices = @transform_1, window_bounds = array<i64: 16, 128>}, {transform_indices = @transform_2, window_bounds = array<i64: 16, 128>}, {transform_indices = @transform_3, window_bounds = array<i64: 16, 128>}]} {
    %c0 = arith.constant 0 : index
    %0 = memref.load %arg1[%c0] : memref<1xi32, #tpu.memory_space<smem>>
    %c2048_i32 = arith.constant 2048 : i32
    %1 = arith.muli %arg0, %c2048_i32 : i32
    %2 = tpu.iota {dimensions = array<i32: 0>} : vector<16x128xi32>
    %3 = tpu.iota {dimensions = array<i32: 1>} : vector<16x128xi32>
    %c128_i32 = arith.constant 128 : i32
    %4 = vector.broadcast %c128_i32 : i32 to vector<16x128xi32>
    %5 = arith.muli %2, %4 : vector<16x128xi32>
    %6 = vector.broadcast %1 : i32 to vector<16x128xi32>
    %7 = arith.addi %6, %5 : vector<16x128xi32>
    %8 = arith.addi %7, %3 : vector<16x128xi32>
    %c0_0 = arith.constant 0 : index
    %c0_1 = arith.constant 0 : index
    %9 = vector.load %arg2[%c0_0, %c0_1] : memref<16x128xf32, #tpu.memory_space<vmem>>, vector<16x128xf32>
    %c-1640531527_i32 = arith.constant -1640531527 : i32
    %10 = vector.broadcast %c-1640531527_i32 : i32 to vector<16x128xi32>
    %11 = arith.muli %8, %10 : vector<16x128xi32>
    %c2146121005_i32 = arith.constant 2146121005 : i32
    %12 = arith.muli %0, %c2146121005_i32 : i32
    %13 = vector.broadcast %12 : i32 to vector<16x128xi32>
    %14 = arith.addi %11, %13 : vector<16x128xi32>
    %c19088743_i32 = arith.constant 19088743 : i32
    %15 = vector.broadcast %c19088743_i32 : i32 to vector<16x128xi32>
    %16 = arith.addi %14, %15 : vector<16x128xi32>
    %c16_i32 = arith.constant 16 : i32
    %17 = vector.broadcast %c16_i32 : i32 to vector<16x128xi32>
    %18 = arith.shrsi %16, %17 : vector<16x128xi32>
    %c65535_i32 = arith.constant 65535 : i32
    %19 = vector.broadcast %c65535_i32 : i32 to vector<16x128xi32>
    %20 = arith.andi %18, %19 : vector<16x128xi32>
    %21 = arith.xori %16, %20 : vector<16x128xi32>
    %c-2048144789_i32 = arith.constant -2048144789 : i32
    %22 = vector.broadcast %c-2048144789_i32 : i32 to vector<16x128xi32>
    %23 = arith.muli %21, %22 : vector<16x128xi32>
    %c13_i32 = arith.constant 13 : i32
    %24 = vector.broadcast %c13_i32 : i32 to vector<16x128xi32>
    %25 = arith.shrsi %23, %24 : vector<16x128xi32>
    %c524287_i32 = arith.constant 524287 : i32
    %26 = vector.broadcast %c524287_i32 : i32 to vector<16x128xi32>
    %27 = arith.andi %25, %26 : vector<16x128xi32>
    %28 = arith.xori %23, %27 : vector<16x128xi32>
    %c-1028477387_i32 = arith.constant -1028477387 : i32
    %29 = vector.broadcast %c-1028477387_i32 : i32 to vector<16x128xi32>
    %30 = arith.muli %28, %29 : vector<16x128xi32>
    %c16_i32_2 = arith.constant 16 : i32
    %31 = vector.broadcast %c16_i32_2 : i32 to vector<16x128xi32>
    %32 = arith.shrsi %30, %31 : vector<16x128xi32>
    %c65535_i32_3 = arith.constant 65535 : i32
    %33 = vector.broadcast %c65535_i32_3 : i32 to vector<16x128xi32>
    %34 = arith.andi %32, %33 : vector<16x128xi32>
    %35 = arith.xori %30, %34 : vector<16x128xi32>
    %c16777215_i32 = arith.constant 16777215 : i32
    %36 = vector.broadcast %c16777215_i32 : i32 to vector<16x128xi32>
    %37 = arith.andi %35, %36 : vector<16x128xi32>
    %c8388608_i32 = arith.constant 8388608 : i32
    %38 = vector.broadcast %c8388608_i32 : i32 to vector<16x128xi32>
    %39 = arith.cmpi sge, %37, %38 : vector<16x128xi32>
    %cst = arith.constant 2.000000e+00 : f32
    %40 = vector.broadcast %cst : f32 to vector<16x128xf32>
    %41 = arith.mulf %9, %40 : vector<16x128xf32>
    %cst_4 = arith.constant 0.000000e+00 : f32
    %42 = vector.broadcast %cst_4 : f32 to vector<16x128xf32>
    %43 = arith.select %39, %41, %42 : vector<16x128xi1>, vector<16x128xf32>
    %c0_5 = arith.constant 0 : index
    %c0_6 = arith.constant 0 : index
    %44 = vector.load %arg4[%c0_5, %c0_6] : memref<16x128xf32, #tpu.memory_space<vmem>>, vector<16x128xf32>
    tpu.vector_store %arg4[%c0_5, %c0_6], %43 {strides = array<i32>} : memref<16x128xf32, #tpu.memory_space<vmem>>, vector<16x128xf32>,
    %c0_7 = arith.constant 0 : index
    %c0_8 = arith.constant 0 : index
    %45 = vector.load %arg3[%c0_7, %c0_8] : memref<16x128xf32, #tpu.memory_space<vmem>>, vector<16x128xf32>
    %c-1640531527_i32_9 = arith.constant -1640531527 : i32
    %46 = vector.broadcast %c-1640531527_i32_9 : i32 to vector<16x128xi32>
    %47 = arith.muli %8, %46 : vector<16x128xi32>
    %c2146121005_i32_10 = arith.constant 2146121005 : i32
    %48 = arith.muli %0, %c2146121005_i32_10 : i32
    %49 = vector.broadcast %48 : i32 to vector<16x128xi32>
    %50 = arith.addi %47, %49 : vector<16x128xi32>
    %c180150001_i32 = arith.constant 180150001 : i32
    %51 = vector.broadcast %c180150001_i32 : i32 to vector<16x128xi32>
    %52 = arith.addi %50, %51 : vector<16x128xi32>
    %c16_i32_11 = arith.constant 16 : i32
    %53 = vector.broadcast %c16_i32_11 : i32 to vector<16x128xi32>
    %54 = arith.shrsi %52, %53 : vector<16x128xi32>
    %c65535_i32_12 = arith.constant 65535 : i32
    %55 = vector.broadcast %c65535_i32_12 : i32 to vector<16x128xi32>
    %56 = arith.andi %54, %55 : vector<16x128xi32>
    %57 = arith.xori %52, %56 : vector<16x128xi32>
    %c-2048144789_i32_13 = arith.constant -2048144789 : i32
    %58 = vector.broadcast %c-2048144789_i32_13 : i32 to vector<16x128xi32>
    %59 = arith.muli %57, %58 : vector<16x128xi32>
    %c13_i32_14 = arith.constant 13 : i32
    %60 = vector.broadcast %c13_i32_14 : i32 to vector<16x128xi32>
    %61 = arith.shrsi %59, %60 : vector<16x128xi32>
    %c524287_i32_15 = arith.constant 524287 : i32
    %62 = vector.broadcast %c524287_i32_15 : i32 to vector<16x128xi32>
    %63 = arith.andi %61, %62 : vector<16x128xi32>
    %64 = arith.xori %59, %63 : vector<16x128xi32>
    %c-1028477387_i32_16 = arith.constant -1028477387 : i32
    %65 = vector.broadcast %c-1028477387_i32_16 : i32 to vector<16x128xi32>
    %66 = arith.muli %64, %65 : vector<16x128xi32>
    %c16_i32_17 = arith.constant 16 : i32
    %67 = vector.broadcast %c16_i32_17 : i32 to vector<16x128xi32>
    %68 = arith.shrsi %66, %67 : vector<16x128xi32>
    %c65535_i32_18 = arith.constant 65535 : i32
    %69 = vector.broadcast %c65535_i32_18 : i32 to vector<16x128xi32>
    %70 = arith.andi %68, %69 : vector<16x128xi32>
    %71 = arith.xori %66, %70 : vector<16x128xi32>
    %c16777215_i32_19 = arith.constant 16777215 : i32
    %72 = vector.broadcast %c16777215_i32_19 : i32 to vector<16x128xi32>
    %73 = arith.andi %71, %72 : vector<16x128xi32>
    %c8388608_i32_20 = arith.constant 8388608 : i32
    %74 = vector.broadcast %c8388608_i32_20 : i32 to vector<16x128xi32>
    %75 = arith.cmpi sge, %73, %74 : vector<16x128xi32>
    %cst_21 = arith.constant 2.000000e+00 : f32
    %76 = vector.broadcast %cst_21 : f32 to vector<16x128xf32>
    %77 = arith.mulf %45, %76 : vector<16x128xf32>
    %cst_22 = arith.constant 0.000000e+00 : f32
    %78 = vector.broadcast %cst_22 : f32 to vector<16x128xf32>
    %79 = arith.select %75, %77, %78 : vector<16x128xi1>, vector<16x128xf32>
    %c0_23 = arith.constant 0 : index
    %c0_24 = arith.constant 0 : index
    %80 = vector.load %arg5[%c0_23, %c0_24] : memref<16x128xf32, #tpu.memory_space<vmem>>, vector<16x128xf32>
    tpu.vector_store %arg5[%c0_23, %c0_24], %79 {strides = array<i32>} : memref<16x128xf32, #tpu.memory_space<vmem>>, vector<16x128xf32>,
    return
  }
  func.func @transform_0(%arg0: i32, %arg1: memref<1xi32, #tpu.memory_space<smem>>) -> (i32, i32) {
    %c0_i32 = arith.constant 0 : i32
    %c0_i32_0 = arith.constant 0 : i32
    return %arg0, %c0_i32 : i32, i32
  }
  func.func @transform_1(%arg0: i32, %arg1: memref<1xi32, #tpu.memory_space<smem>>) -> (i32, i32) {
    %c0_i32 = arith.constant 0 : i32
    %c0_i32_0 = arith.constant 0 : i32
    return %arg0, %c0_i32 : i32, i32
  }
  func.func @transform_2(%arg0: i32, %arg1: memref<1xi32, #tpu.memory_space<smem>>) -> (i32, i32) {
    %c0_i32 = arith.constant 0 : i32
    %c0_i32_0 = arith.constant 0 : i32
    return %arg0, %c0_i32 : i32, i32
  }
  func.func @transform_3(%arg0: i32, %arg1: memref<1xi32, #tpu.memory_space<smem>>) -> (i32, i32) {
    %c0_i32 = arith.constant 0 : i32
    %c0_i32_0 = arith.constant 0 : i32
    return %arg0, %c0_i32 : i32, i32
  }
}

</mosaic_0001>

<bundles_post_ra>
// kernel: tpu_custom_call.1
= control target key start
LH: loop header
LB: loop body
LE: loop exit
PB: predicated region body
PF: predicated region fallthrough
CT: control target
= control target key end

     0   :  { %11 = vsyncpa [#allocation5], 0  ;;  %s386_s0 = inlined_call_operand.<no memory space> [shape: s32[1], index: 0, kind: input, shape index: {}]   ;;  %s387_s1 = inlined_call_operand.hbm [shape: f32[16,128], index: 1, kind: input, shape index: {}]   ;;  %s388_s2 = inlined_call_operand.hbm [shape: f32[16,128], index: 2, kind: input, shape index: {}]   ;;  %s389_s3 = inlined_call_operand.hbm [shape: f32[16,128], index: 3, kind: output, shape index: {0}]   ;;  %s390_s4 = inlined_call_operand.hbm [shape: f32[16,128], index: 4, kind: output, shape index: {1}]  }
   0x1   :  { %12 = vsyncpa [#allocation8], 0 }
   0x2   :  { %13 = vsyncpa [#allocation6], 0 }
   0x3   :  { %14 = vsyncpa [#allocation11], 0  ;;  %s285_s15 = smov [#allocation4]   ;;  %s189_s19 = scalar_lea.hbm %s387_s1, 256 }
   0x4   :  { %s20_s16 = sshll.u32 %s285_s15, 4  ;;  %p190_p0 = scmp.ne.s32.totalorder %s387_s1, %s189_s19  ;;  %s21_s16 = int_to_ptr.vmem [resolvable:$true] %s20_s16 }
   0x5   :  { %p193_p1 = scmp.lt.u32.totalorder %s189_s19, %s387_s1 }
   0x7   :  { %p195_p2 = pnand %p193_p1, %p190_p0 }
   0x9   :  { %198 = shalt.err (!%p195_p2)
}
   0xa   :  { %s199_s24 = scalar_lea.vmem %s21_s16, 256  ;;  %p204_p4 = scmp.lt.s32.totalorder %s21_s16, %s21_s16 }
   0xb   :  { %p200_p3 = scmp.ne.s32.totalorder %s21_s16, %s199_s24  ;;  %p205_p5 = scmp.lt.s32.totalorder %s199_s24, %s199_s24 }
   0xd   :  { %p206_p6 = por %p205_p5, %p204_p4 }
   0xf   :  { %p207_p7 = pnand %p206_p6, %p200_p3 }
  0x11   :  { %210 = shalt.err (!%p207_p7)
}
  0x12   :  { %s286_s25 = smov 128   ;;  %s287_s26 = smov 8  }
  0x13   :  { %26 = dma.hbm_to_vmem [thread:$0]  %s387_s1, 256, %s21_s16, [#allocation5], %s286_s25, %s286_s25, %s287_s26  }
  0x14   :  { %s288_s29 = smov [#allocation7]   ;;  %s211_s7 = scalar_lea.hbm %s388_s2, 256 }
  0x15   :  { %s32_s30 = sshll.u32 %s288_s29, 4  ;;  %p212_p8 = scmp.ne.s32.totalorder %s388_s2, %s211_s7  ;;  %s33_s30 = int_to_ptr.vmem [resolvable:$true] %s32_s30 }
  0x16   :  { %p215_p9 = scmp.lt.u32.totalorder %s211_s7, %s388_s2 }
  0x18   :  { %p217_p10 = pnand %p215_p9, %p212_p8 }
  0x1a   :  { %220 = shalt.err (!%p217_p10)
}
  0x1b   :  { %s221_s12 = scalar_lea.vmem %s33_s30, 256  ;;  %p226_p12 = scmp.lt.s32.totalorder %s33_s30, %s33_s30 }
  0x1c   :  { %p222_p11 = scmp.ne.s32.totalorder %s33_s30, %s221_s12  ;;  %p227_p13 = scmp.lt.s32.totalorder %s221_s12, %s221_s12 }
  0x1e   :  { %p228_p0 = por %p227_p13, %p226_p12 }
  0x20   :  { %p229_p1 = pnand %p228_p0, %p222_p11 }
  0x22   :  { %232 = shalt.err (!%p229_p1)
}
  0x23   :  { %38 = dma.hbm_to_vmem [thread:$0]  %s388_s2, 256, %s33_s30, [#allocation8], %s286_s25, %s286_s25, %s287_s26  }
  0x24   :  { %277 = dma.done.wait [#allocation5], 256  }
  0x25   :  { %278 = vsyncadd [#allocation5], 4294967040 }
  0x26   :  { %279 = dma.done.wait [#allocation8], 256  }
  0x27   :  { %280 = vsyncadd [#allocation8], 4294967040  ;;  %v47_v0 = vlaneseq  ;;  %s63_s16 = smul.u32 2146121005, %s386_s0  ;;  %v59_v39 = vld [vmem:[#allocation4] sm:$0xff]  ;;  %v101_v40 = vld [vmem:[#allocation7] sm:$0xff] }
  0x28   :  { %v60_v46 = vld [vmem:[#allocation4 + $0x8] sm:$0xff]  ;;  %v102_v49 = vld [vmem:[#allocation7 + $0x8] sm:$0xff]  ;;  %v95_v51 = vmul.f32 2.0, %v59_v39  ;;  %v131_v52 = vmul.f32 2.0, %v101_v40  ;;  %s289_s0 = smov [#allocation9]   ;;  %s290_s17 = smov [#allocation10]  }
  0x29   :  { %v48_v1 = vshrl.u32 %v47_v0, 7  ;;  %v51_v2 = vand.u32 127, %v47_v0  ;;  %v64_v7 = vstv %s63_s16  ;;  %v96_v57 = vmul.f32 2.0, %v60_v46  ;;  %s142_s2 = sshll.u32 %s289_s0, 4  ;;  %s154_s18 = sshll.u32 %s290_s17, 4  ;;  %s143_s2 = int_to_ptr.vmem [resolvable:$true] %s142_s2  ;;  %s349_s18 = int_to_ptr.vmem [resolvable:$true] %s154_s18 }
  0x2a   :  { %v132_v58 = vmul.f32 2.0, %v102_v49  ;;  %s233_s19 = scalar_lea.vmem %s143_s2, 256  ;;  %p238_p3 = scmp.lt.s32.totalorder %s143_s2, %s143_s2 }
  0x2b   :  { %v52_v3 = vmul.u32 128, %v48_v1  ;;  %v49_v4 = vadd.s32 8, %v48_v1  ;;  %p234_p2 = scmp.ne.s32.totalorder %s143_s2, %s233_s19  ;;  %p239_p4 = scmp.lt.s32.totalorder %s233_s19, %s233_s19 }
  0x2d   :  { %v57_v5 = vadd.s32 %v52_v3, %v51_v2  ;;  %v53_v6 = vmul.u32 128, %v49_v4  ;;  %p240_p5 = por %p239_p4, %p238_p3 }
  0x2f   :  { %v61_v8 = vmul.u32 2654435769, %v57_v5  ;;  %v58_v9 = vadd.s32 %v53_v6, %v51_v2  ;;  %p241_p6 = pnand %p240_p5, %p234_p2 }
  0x31   :  { %v65_v10 = vadd.s32 %v64_v7, %v61_v8  ;;  %v62_v11 = vmul.u32 2654435769, %v58_v9 }
  0x33   :  { %v67_v12 = vadd.s32 19088743, %v65_v10  ;;  %v66_v13 = vadd.s32 %v64_v7, %v62_v11  ;;  %v103_v14 = vadd.s32 180150001, %v65_v10 }
  0x35   :  { %v171_v15 = vshrl.u32 %v67_v12, 16  ;;  %v68_v16 = vadd.s32 19088743, %v66_v13  ;;  %v177_v17 = vshrl.u32 %v103_v14, 16  ;;  %v104_v18 = vadd.s32 180150001, %v66_v13 }
  0x37   :  { %v73_v19 = vxor.u32 %v171_v15, %v67_v12  ;;  %v172_v20 = vshrl.u32 %v68_v16, 16  ;;  %v109_v21 = vxor.u32 %v177_v17, %v103_v14  ;;  %v178_v22 = vshrl.u32 %v104_v18, 16 }
  0x39   :  { %v75_v23 = vmul.u32 2246822507, %v73_v19  ;;  %v74_v24 = vxor.u32 %v172_v20, %v68_v16  ;;  %v111_v25 = vmul.u32 2246822507, %v109_v21  ;;  %v110_v26 = vxor.u32 %v178_v22, %v104_v18 }
  0x3b   :  { %v173_v27 = vshrl.u32 %v75_v23, 13  ;;  %v76_v28 = vmul.u32 2246822507, %v74_v24  ;;  %v179_v29 = vshrl.u32 %v111_v25, 13  ;;  %v112_v30 = vmul.u32 2246822507, %v110_v26 }
  0x3d   :  { %v81_v31 = vxor.u32 %v173_v27, %v75_v23  ;;  %v174_v32 = vshrl.u32 %v76_v28, 13  ;;  %v117_v33 = vxor.u32 %v179_v29, %v111_v25  ;;  %v180_v34 = vshrl.u32 %v112_v30, 13 }
  0x3f   :  { %v83_v35 = vmul.u32 3266489909, %v81_v31  ;;  %v82_v36 = vxor.u32 %v174_v32, %v76_v28  ;;  %v119_v37 = vmul.u32 3266489909, %v117_v33  ;;  %v118_v38 = vxor.u32 %v180_v34, %v112_v30 }
  0x41   :  { %v175_v41 = vshrl.u32 %v83_v35, 16  ;;  %v84_v42 = vmul.u32 3266489909, %v82_v36  ;;  %v181_v43 = vshrl.u32 %v119_v37, 16  ;;  %v120_v44 = vmul.u32 3266489909, %v118_v38 }
  0x43   :  { %v89_v45 = vxor.u32 %v175_v41, %v83_v35  ;;  %v176_v47 = vshrl.u32 %v84_v42, 16  ;;  %v125_v48 = vxor.u32 %v181_v43, %v119_v37  ;;  %v182_v50 = vshrl.u32 %v120_v44, 16 }
  0x45   :  { %v91_v53 = vand.u32 16777215, %v89_v45  ;;  %v90_v54 = vxor.u32 %v176_v47, %v84_v42  ;;  %v127_v55 = vand.u32 16777215, %v125_v48  ;;  %v126_v56 = vxor.u32 %v182_v50, %v120_v44 }
  0x47   :  { %vm93_vm0 = vcmp.ge.s32.totalorder %v91_v53, 8388608  ;;  %v92_v59 = vand.u32 16777215, %v90_v54  ;;  %vm129_vm1 = vcmp.ge.s32.totalorder %v127_v55, 8388608  ;;  %v128_v60 = vand.u32 16777215, %v126_v56 }
  0x48   :  { %v97_v61 = vsel %vm93_vm0, %v95_v51, 0.0  ;;  %v133_v62 = vsel %vm129_vm1, %v131_v52, 0.0 }
  0x49   :  { %99 = vst [vmem:[#allocation9] sm:$0xff] %v97_v61  ;;  %vm94_vm2 = vcmp.ge.s32.totalorder %v92_v59, 8388608  ;;  %135 = vst [vmem:[#allocation10] sm:$0xff] %v133_v62  ;;  %vm130_vm3 = vcmp.ge.s32.totalorder %v128_v60, 8388608 }
  0x4a   :  { %v98_v63 = vsel %vm94_vm2, %v96_v57, 0.0  ;;  %v134_v0 = vsel %vm130_vm3, %v132_v58, 0.0 }
  0x4b   :  { %100 = vst [vmem:[#allocation9 + $0x8] sm:$0xff] %v98_v63  ;;  %136 = vst [vmem:[#allocation10 + $0x8] sm:$0xff] %v134_v0 }
  0x4c   :  { %244 = shalt.err (!%p241_p6)
}
  0x4d   :  { %s245_s22 = scalar_lea.hbm %s389_s3, 256 }
  0x4e   :  { %p246_p7 = scmp.ne.s32.totalorder %s389_s3, %s245_s22  ;;  %p249_p8 = scmp.lt.u32.totalorder %s245_s22, %s389_s3 }
  0x50   :  { %p251_p9 = pnand %p249_p8, %p246_p7 }
  0x52   :  { %254 = shalt.err (!%p251_p9)
}
  0x53   :  { %148 = dma.vmem_to_hbm [thread:$0]  %s143_s2, 256, %s389_s3, [#allocation6], %s286_s25, %s286_s25, %s287_s26  }
  0x54   :  { %s255_s5 = scalar_lea.vmem %s349_s18, 256  ;;  %p260_p11 = scmp.lt.s32.totalorder %s349_s18, %s349_s18 }
  0x55   :  { %p256_p10 = scmp.ne.s32.totalorder %s349_s18, %s255_s5  ;;  %p261_p12 = scmp.lt.s32.totalorder %s255_s5, %s255_s5 }
  0x57   :  { %p262_p13 = por %p261_p12, %p260_p11 }
  0x59   :  { %p263_p0 = pnand %p262_p13, %p256_p10 }
  0x5b   :  { %266 = shalt.err (!%p263_p0)
}
  0x5c   :  { %s267_s8 = scalar_lea.hbm %s390_s4, 256 }
  0x5d   :  { %p268_p1 = scmp.ne.s32.totalorder %s390_s4, %s267_s8  ;;  %p271_p2 = scmp.lt.u32.totalorder %s267_s8, %s390_s4 }
  0x5f   :  { %p273_p3 = pnand %p271_p2, %p268_p1 }
  0x61   :  { %276 = shalt.err (!%p273_p3)
}
  0x62   :  { %160 = dma.vmem_to_hbm [thread:$0]  %s349_s18, 256, %s390_s4, [#allocation11], %s286_s25, %s286_s25, %s287_s26  }
  0x63   :  { %281 = dma.done.wait [#allocation6], 256  }
  0x64   :  { %282 = vsyncadd [#allocation6], 4294967040 }
  0x65   :  { %283 = dma.done.wait [#allocation11], 256  }
  0x66   :  { %284 = vsyncadd [#allocation11], 4294967040 }
  0x67   :  { %167 = vsyncpa [#allocation5], 1 }
  0x68   :  { %168 = vsyncpa [#allocation8], 1 }
  0x69   :  { %169 = vsyncpa [#allocation6], 1 }
  0x6a   :  { %170 = vsyncpa [#allocation11], 1 }

</bundles_post_ra>
